<compile_context>
chip_gen: v7x
topology: tpu7x:2x2x1
jax: 0.10.0
libtpu: 0.0.40
codegen_flags: <defaults>
</compile_context>

<pallas_src>
import jax
import jax.numpy as jnp
import numpy as np
from jax.experimental import pallas as pl
from jax.experimental.pallas import tpu as pltpu


def _make_col_select(k, wc, dtype):
    """S[jj*k + xx, xx*wc + jj] = 1, so (rows @ S)[:, xx*wc + jj] = rows[:, jj*k + xx]."""
    Wc = k * wc
    m = np.zeros((Wc, Wc), dtype=np.float32)
    for xx in range(k):
        m[np.arange(wc) * k + xx, xx * wc + np.arange(wc)] = 1.0
    return jnp.asarray(m, dtype=dtype)


def _pick_wchunk(W, k):
    """Input-column chunk width per matmul; prefer 128-lane output slabs."""
    for wc_out in (128, 256):
        Wc = wc_out * k
        if W % Wc == 0:
            return Wc
    return W                       # small / odd widths: single chunk


def _vmem_capacity_bytes():
    try:
        cap = int(getattr(pltpu.get_tpu_info(), "vmem_capacity_bytes", 0))
        if cap >= (64 << 20):
            return min(cap, 128 << 20)
    except Exception:
        pass
    return 64 << 20                # conservative: assume v7x-class (64 MiB)


def _pick_tiling(B, C, h, k, W, itemsize, tile_budget_bytes, min_steps=4):
    """Pick (cblk, hb): biggest double-buffered block fitting the budget, then
    split until the grid has >= min_steps steps (pipelining + both v7x TCs)."""
    unit = 4 * k * W * itemsize    # dbl-buffered in+out bytes per (channel, out-row)
    c_divs = [d for d in range(C, 0, -1) if C % d == 0]
    h_divs = [d for d in range(h, 0, -1) if h % d == 0 and (d % 8 == 0 or d == h)]

    cblk, hb = 1, h_divs[-1]
    fits = [d for d in c_divs if d * h * unit <= tile_budget_bytes]
    if fits:
        cblk, hb = fits[0], h
    else:
        cblk = 1
        for hv in h_divs:
            if hv * unit <= tile_budget_bytes:
                hb = hv
                break

    def n_steps(cb, hv):
        return B * (C // cb) * (h // hv)

    while n_steps(cblk, hb) < min_steps:
        smaller_c = [d for d in c_divs if d < cblk]
        smaller_h = [d for d in h_divs if d < hb]
        if smaller_c:
            cblk = smaller_c[0]
        elif smaller_h:
            hb = smaller_h[0]
        else:
            break
    return cblk, hb


def _make_kernel(k, hb, w, cblk, W, Wc, acc_dtype):
    kk = k * k
    wc = Wc // k
    n_chunks = W // Wc

    def kernel(x_ref, sel_ref, o_ref):
        # x_ref:   (1, cblk, hb, k*W)   lanes of out-row i are [y*W + col]
        # sel_ref: (Wc, Wc)             shared 0/1 lane de-interleave matrix
        # o_ref:   (1, cblk*k*k, hb, w)
        sel = sel_ref[...]

        def per_channel(c, carry):
            for y in range(k):                 # k is tiny -> static unroll
                for t in range(n_chunks):      # W // Wc chunks -> static unroll
                    lane0 = y * W + t * Wc
                    chunk = x_ref[0, c, :, lane0:lane0 + Wc]             # (hb, Wc)
                    # res[:, xx*wc + jj] == chunk[:, jj*k + xx]  (exact, 0/1 weights)
                    res = jnp.dot(chunk, sel,
                                  preferred_element_type=acc_dtype)      # (hb, Wc)
                    res = res.astype(o_ref.dtype)
                    for xx in range(k):
                        o_ref[0, c * kk + y * k + xx, :,
                              t * wc:(t + 1) * wc] = res[:, xx * wc:(xx + 1) * wc]
            return carry

        jax.lax.fori_loop(0, cblk, per_channel, 0, unroll=min(cblk, 2))

    return kernel


def pixel_unshuffle(x, downscale_factor):
    """x: (B, C, H, W) -> (B, C*k*k, H//k, W//k) with PyTorch channel ordering."""
    k = int(downscale_factor)
    B, C, H, W = x.shape
    if k == 1:
        return x
    if H % k or W % k:
        raise ValueError(f"H={H}, W={W} must be divisible by k={k}")
    if not jnp.issubdtype(x.dtype, jnp.floating):
        # TODO(synk): integer tensors would need a non-MXU permute path; the
        # PyTorch reference (F.conv2d) only supports float inputs anyway.
        raise TypeError(f"pixel_unshuffle kernel requires a float dtype, got {x.dtype}")

    h, w = H // k, W // k
    Wc = _pick_wchunk(W, k)
    wc = Wc // k

    acc_dtype = jnp.bfloat16 if x.dtype == jnp.bfloat16 else jnp.float32
    sel = _make_col_select(k, wc, x.dtype)

    itemsize = jnp.dtype(x.dtype).itemsize
    vmem_cap = _vmem_capacity_bytes()
    tile_budget = (vmem_cap * 5) // 8          # ~40 MiB on v7x, ~80 MiB on v5e/v6e
    cblk, hb = _pick_tiling(B, C, h, k, W, itemsize, tile_budget, min_steps=4)

    tiles_bytes = 4 * cblk * hb * k * W * itemsize + 2 * sel.size * sel.dtype.itemsize
    vmem_limit = int(max(min(vmem_cap - (12 << 20), tiles_bytes + (8 << 20)),
                         16 << 20))

    # Free, contiguous view: out-row i holds the k original rows {i*k + y};
    # original column `col` of parity-y row sits at lane y*W + col.
    xv = x.reshape(B, C, h, k * W)

    grid = (B, C // cblk, h // hb)
    return pl.pallas_call(
        _make_kernel(k, hb, w, cblk, W, Wc, acc_dtype),
        out_shape=jax.ShapeDtypeStruct((B, C * k * k, h, w), x.dtype),
        grid=grid,
        in_specs=[
            pl.BlockSpec((1, cblk, hb, k * W), lambda b, ci, hi: (b, ci, hi, 0)),
            pl.BlockSpec((Wc, Wc), lambda b, ci, hi: (0, 0)),
        ],
        out_specs=pl.BlockSpec((1, cblk * k * k, hb, w),
                               lambda b, ci, hi: (b, ci, hi, 0)),
        compiler_params=pltpu.CompilerParams(
            dimension_semantics=("parallel", "parallel", "parallel"),
            vmem_limit_bytes=vmem_limit),
    )(xv, sel)


class PixelUnshuffle:
    """Mirror of the PyTorch nn.Module (no learnable parameters)."""

    def __init__(self, downscale_factor):
        self.downscale_factor = downscale_factor

    def __call__(self, x):
        return pixel_unshuffle(x, self.downscale_factor)


def _reference(x, k):
    """Pure-JAX reference with identical channel ordering (c*k*k + y*k + x)."""
    B, C, H, W = x.shape
    r = x.reshape(B, C, H // k, k, W // k, k)
    return jnp.transpose(r, (0, 1, 3, 5, 2, 4)).reshape(B, C * k * k, H // k, W // k)


if __name__ == "__main__":
    key = jax.random.PRNGKey(0)

    # Primary check: the module's typical small-shape usage (f32, k=2).
    B, C, H, W, k = 2, 4, 16, 16, 2
    x = jax.random.normal(key, (B, C, H, W), dtype=jnp.float32)
    out = jax.block_until_ready(PixelUnshuffle(k)(x))
    assert out.shape == (B, C * k * k, H // k, W // k)
    np.testing.assert_allclose(np.asarray(out), np.asarray(_reference(x, k)),
                               rtol=0, atol=0)

    # Secondary check: bf16, k=4, B=1, non-power-of-two channel count.
    x2 = jax.random.normal(jax.random.PRNGKey(0), (1, 3, 16, 16), dtype=jnp.bfloat16)
    out2 = jax.block_until_ready(pixel_unshuffle(x2, 4))
    np.testing.assert_allclose(np.asarray(out2).astype(np.float32),
                               np.asarray(_reference(x2, 4)).astype(np.float32),
                               rtol=0, atol=0)

    print("KERNEL_OK")
</pallas_src>

<mosaic_0001>
module attributes {stable_mosaic.version = 11 : i64} {
  func.func @kernel(%arg0: i32, %arg1: i32, %arg2: i32, %arg3: memref<1x2x8x32xf32, #tpu.memory_space<vmem>>, %arg4: memref<16x16xf32, #tpu.memory_space<vmem>>, %arg5: memref<1x8x8x8xf32, #tpu.memory_space<vmem>>) attributes {dimension_semantics = [#tpu.dimension_semantics<parallel>, #tpu.dimension_semantics<parallel>, #tpu.dimension_semantics<parallel>], iteration_bounds = array<i64: 2, 2, 1>, scalar_prefetch = 0 : i64, scratch_operands = 0 : i64, tpu.core_type = #tpu.core_type<tc>, window_params = [{transform_indices = @transform_0, window_bounds = array<i64: 1, 2, 8, 32>}, {pipeline_mode = #tpu.pipeline_mode<synchronous>, transform_indices = @transform_1, window_bounds = array<i64: 16, 16>}, {transform_indices = @transform_2, window_bounds = array<i64: 1, 8, 8, 8>}]} {
    %c0 = arith.constant 0 : index
    %c0_0 = arith.constant 0 : index
    %0 = vector.load %arg4[%c0, %c0_0] : memref<16x16xf32, #tpu.memory_space<vmem>>, vector<16x16xf32>
    %c0_i32 = arith.constant 0 : i32
    %c0_1 = arith.constant 0 : index
    %1 = arith.index_cast %c0_i32 : i32 to index
    %c0_2 = arith.constant 0 : index
    %c0_3 = arith.constant 0 : index
    %2 = vector.load %arg3[%c0_1, %1, %c0_2, %c0_3] : memref<1x2x8x32xf32, #tpu.memory_space<vmem>>, vector<1x1x8x16xf32>
    %3 = vector.shape_cast %2 : vector<1x1x8x16xf32> to vector<8x16xf32>
    %cst = arith.constant dense<0.000000e+00> : vector<8x16xf32>
    %4 = tpu.matmul %3, %0, %cst {dimension_numbers = #tpu.dot_dimension_numbers<[1], [0], [0], [1], [0, 0, 1, 1], [], []>} : vector<8x16xf32>, vector<16x16xf32>, vector<8x16xf32> -> vector<8x16xf32>
    %5 = vector.extract_strided_slice %4 {offsets = [0, 0], sizes = [8, 8], strides = [1, 1]} : vector<8x16xf32> to vector<8x8xf32>
    %c4_i32 = arith.constant 4 : i32
    %6 = arith.muli %c0_i32, %c4_i32 : i32
    %c0_i32_4 = arith.constant 0 : i32
    %7 = arith.addi %6, %c0_i32_4 : i32
    %c0_i32_5 = arith.constant 0 : i32
    %8 = arith.addi %7, %c0_i32_5 : i32
    %c0_6 = arith.constant 0 : index
    %9 = arith.index_cast %8 : i32 to index
    %c0_7 = arith.constant 0 : index
    %c0_8 = arith.constant 0 : index
    %10 = vector.load %arg5[%c0_6, %9, %c0_7, %c0_8] : memref<1x8x8x8xf32, #tpu.memory_space<vmem>>, vector<1x1x8x8xf32>
    %11 = vector.shape_cast %10 : vector<1x1x8x8xf32> to vector<8x8xf32>
    %12 = vector.shape_cast %5 : vector<8x8xf32> to vector<1x1x8x8xf32>
    tpu.vector_store %arg5[%c0_6, %9, %c0_7, %c0_8], %12 {strides = array<i32>} : memref<1x8x8x8xf32, #tpu.memory_space<vmem>>, vector<1x1x8x8xf32>,
    %13 = vector.extract_strided_slice %4 {offsets = [0, 8], sizes = [8, 8], strides = [1, 1]} : vector<8x16xf32> to vector<8x8xf32>
    %c4_i32_9 = arith.constant 4 : i32
    %14 = arith.muli %c0_i32, %c4_i32_9 : i32
    %c0_i32_10 = arith.constant 0 : i32
    %15 = arith.addi %14, %c0_i32_10 : i32
    %c1_i32 = arith.constant 1 : i32
    %16 = arith.addi %15, %c1_i32 : i32
    %c0_11 = arith.constant 0 : index
    %17 = arith.index_cast %16 : i32 to index
    %c0_12 = arith.constant 0 : index
    %c0_13 = arith.constant 0 : index
    %18 = vector.load %arg5[%c0_11, %17, %c0_12, %c0_13] : memref<1x8x8x8xf32, #tpu.memory_space<vmem>>, vector<1x1x8x8xf32>
    %19 = vector.shape_cast %18 : vector<1x1x8x8xf32> to vector<8x8xf32>
    %20 = vector.shape_cast %13 : vector<8x8xf32> to vector<1x1x8x8xf32>
    tpu.vector_store %arg5[%c0_11, %17, %c0_12, %c0_13], %20 {strides = array<i32>} : memref<1x8x8x8xf32, #tpu.memory_space<vmem>>, vector<1x1x8x8xf32>,
    %c0_14 = arith.constant 0 : index
    %21 = arith.index_cast %c0_i32 : i32 to index
    %c0_15 = arith.constant 0 : index
    %c16 = arith.constant 16 : index
    %22 = vector.load %arg3[%c0_14, %21, %c0_15, %c16] : memref<1x2x8x32xf32, #tpu.memory_space<vmem>>, vector<1x1x8x16xf32>
    %23 = vector.shape_cast %22 : vector<1x1x8x16xf32> to vector<8x16xf32>
    %cst_16 = arith.constant dense<0.000000e+00> : vector<8x16xf32>
    %24 = tpu.matmul %23, %0, %cst_16 {dimension_numbers = #tpu.dot_dimension_numbers<[1], [0], [0], [1], [0, 0, 1, 1], [], []>} : vector<8x16xf32>, vector<16x16xf32>, vector<8x16xf32> -> vector<8x16xf32>
    %25 = vector.extract_strided_slice %24 {offsets = [0, 0], sizes = [8, 8], strides = [1, 1]} : vector<8x16xf32> to vector<8x8xf32>
    %c4_i32_17 = arith.constant 4 : i32
    %26 = arith.muli %c0_i32, %c4_i32_17 : i32
    %c2_i32 = arith.constant 2 : i32
    %27 = arith.addi %26, %c2_i32 : i32
    %c0_i32_18 = arith.constant 0 : i32
    %28 = arith.addi %27, %c0_i32_18 : i32
    %c0_19 = arith.constant 0 : index
    %29 = arith.index_cast %28 : i32 to index
    %c0_20 = arith.constant 0 : index
    %c0_21 = arith.constant 0 : index
    %30 = vector.load %arg5[%c0_19, %29, %c0_20, %c0_21] : memref<1x8x8x8xf32, #tpu.memory_space<vmem>>, vector<1x1x8x8xf32>
    %31 = vector.shape_cast %30 : vector<1x1x8x8xf32> to vector<8x8xf32>
    %32 = vector.shape_cast %25 : vector<8x8xf32> to vector<1x1x8x8xf32>
    tpu.vector_store %arg5[%c0_19, %29, %c0_20, %c0_21], %32 {strides = array<i32>} : memref<1x8x8x8xf32, #tpu.memory_space<vmem>>, vector<1x1x8x8xf32>,
    %33 = vector.extract_strided_slice %24 {offsets = [0, 8], sizes = [8, 8], strides = [1, 1]} : vector<8x16xf32> to vector<8x8xf32>
    %c4_i32_22 = arith.constant 4 : i32
    %34 = arith.muli %c0_i32, %c4_i32_22 : i32
    %c2_i32_23 = arith.constant 2 : i32
    %35 = arith.addi %34, %c2_i32_23 : i32
    %c1_i32_24 = arith.constant 1 : i32
    %36 = arith.addi %35, %c1_i32_24 : i32
    %c0_25 = arith.constant 0 : index
    %37 = arith.index_cast %36 : i32 to index
    %c0_26 = arith.constant 0 : index
    %c0_27 = arith.constant 0 : index
    %38 = vector.load %arg5[%c0_25, %37, %c0_26, %c0_27] : memref<1x8x8x8xf32, #tpu.memory_space<vmem>>, vector<1x1x8x8xf32>
    %39 = vector.shape_cast %38 : vector<1x1x8x8xf32> to vector<8x8xf32>
    %40 = vector.shape_cast %33 : vector<8x8xf32> to vector<1x1x8x8xf32>
    tpu.vector_store %arg5[%c0_25, %37, %c0_26, %c0_27], %40 {strides = array<i32>} : memref<1x8x8x8xf32, #tpu.memory_space<vmem>>, vector<1x1x8x8xf32>,
    %c1_i32_28 = arith.constant 1 : i32
    %c0_29 = arith.constant 0 : index
    %41 = arith.index_cast %c1_i32_28 : i32 to index
    %c0_30 = arith.constant 0 : index
    %c0_31 = arith.constant 0 : index
    %42 = vector.load %arg3[%c0_29, %41, %c0_30, %c0_31] : memref<1x2x8x32xf32, #tpu.memory_space<vmem>>, vector<1x1x8x16xf32>
    %43 = vector.shape_cast %42 : vector<1x1x8x16xf32> to vector<8x16xf32>
    %cst_32 = arith.constant dense<0.000000e+00> : vector<8x16xf32>
    %44 = tpu.matmul %43, %0, %cst_32 {dimension_numbers = #tpu.dot_dimension_numbers<[1], [0], [0], [1], [0, 0, 1, 1], [], []>} : vector<8x16xf32>, vector<16x16xf32>, vector<8x16xf32> -> vector<8x16xf32>
    %45 = vector.extract_strided_slice %44 {offsets = [0, 0], sizes = [8, 8], strides = [1, 1]} : vector<8x16xf32> to vector<8x8xf32>
    %c4_i32_33 = arith.constant 4 : i32
    %46 = arith.muli %c1_i32_28, %c4_i32_33 : i32
    %c0_i32_34 = arith.constant 0 : i32
    %47 = arith.addi %46, %c0_i32_34 : i32
    %c0_i32_35 = arith.constant 0 : i32
    %48 = arith.addi %47, %c0_i32_35 : i32
    %c0_36 = arith.constant 0 : index
    %49 = arith.index_cast %48 : i32 to index
    %c0_37 = arith.constant 0 : index
    %c0_38 = arith.constant 0 : index
    %50 = vector.load %arg5[%c0_36, %49, %c0_37, %c0_38] : memref<1x8x8x8xf32, #tpu.memory_space<vmem>>, vector<1x1x8x8xf32>
    %51 = vector.shape_cast %50 : vector<1x1x8x8xf32> to vector<8x8xf32>
    %52 = vector.shape_cast %45 : vector<8x8xf32> to vector<1x1x8x8xf32>
    tpu.vector_store %arg5[%c0_36, %49, %c0_37, %c0_38], %52 {strides = array<i32>} : memref<1x8x8x8xf32, #tpu.memory_space<vmem>>, vector<1x1x8x8xf32>,
    %53 = vector.extract_strided_slice %44 {offsets = [0, 8], sizes = [8, 8], strides = [1, 1]} : vector<8x16xf32> to vector<8x8xf32>
    %c4_i32_39 = arith.constant 4 : i32
    %54 = arith.muli %c1_i32_28, %c4_i32_39 : i32
    %c0_i32_40 = arith.constant 0 : i32
    %55 = arith.addi %54, %c0_i32_40 : i32
    %c1_i32_41 = arith.constant 1 : i32
    %56 = arith.addi %55, %c1_i32_41 : i32
    %c0_42 = arith.constant 0 : index
    %57 = arith.index_cast %56 : i32 to index
    %c0_43 = arith.constant 0 : index
    %c0_44 = arith.constant 0 : index
    %58 = vector.load %arg5[%c0_42, %57, %c0_43, %c0_44] : memref<1x8x8x8xf32, #tpu.memory_space<vmem>>, vector<1x1x8x8xf32>
    %59 = vector.shape_cast %58 : vector<1x1x8x8xf32> to vector<8x8xf32>
    %60 = vector.shape_cast %53 : vector<8x8xf32> to vector<1x1x8x8xf32>
    tpu.vector_store %arg5[%c0_42, %57, %c0_43, %c0_44], %60 {strides = array<i32>} : memref<1x8x8x8xf32, #tpu.memory_space<vmem>>, vector<1x1x8x8xf32>,
    %c0_45 = arith.constant 0 : index
    %61 = arith.index_cast %c1_i32_28 : i32 to index
    %c0_46 = arith.constant 0 : index
    %c16_47 = arith.constant 16 : index
    %62 = vector.load %arg3[%c0_45, %61, %c0_46, %c16_47] : memref<1x2x8x32xf32, #tpu.memory_space<vmem>>, vector<1x1x8x16xf32>
    %63 = vector.shape_cast %62 : vector<1x1x8x16xf32> to vector<8x16xf32>
    %cst_48 = arith.constant dense<0.000000e+00> : vector<8x16xf32>
    %64 = tpu.matmul %63, %0, %cst_48 {dimension_numbers = #tpu.dot_dimension_numbers<[1], [0], [0], [1], [0, 0, 1, 1], [], []>} : vector<8x16xf32>, vector<16x16xf32>, vector<8x16xf32> -> vector<8x16xf32>
    %65 = vector.extract_strided_slice %64 {offsets = [0, 0], sizes = [8, 8], strides = [1, 1]} : vector<8x16xf32> to vector<8x8xf32>
    %c4_i32_49 = arith.constant 4 : i32
    %66 = arith.muli %c1_i32_28, %c4_i32_49 : i32
    %c2_i32_50 = arith.constant 2 : i32
    %67 = arith.addi %66, %c2_i32_50 : i32
    %c0_i32_51 = arith.constant 0 : i32
    %68 = arith.addi %67, %c0_i32_51 : i32
    %c0_52 = arith.constant 0 : index
    %69 = arith.index_cast %68 : i32 to index
    %c0_53 = arith.constant 0 : index
    %c0_54 = arith.constant 0 : index
    %70 = vector.load %arg5[%c0_52, %69, %c0_53, %c0_54] : memref<1x8x8x8xf32, #tpu.memory_space<vmem>>, vector<1x1x8x8xf32>
    %71 = vector.shape_cast %70 : vector<1x1x8x8xf32> to vector<8x8xf32>
    %72 = vector.shape_cast %65 : vector<8x8xf32> to vector<1x1x8x8xf32>
    tpu.vector_store %arg5[%c0_52, %69, %c0_53, %c0_54], %72 {strides = array<i32>} : memref<1x8x8x8xf32, #tpu.memory_space<vmem>>, vector<1x1x8x8xf32>,
    %73 = vector.extract_strided_slice %64 {offsets = [0, 8], sizes = [8, 8], strides = [1, 1]} : vector<8x16xf32> to vector<8x8xf32>
    %c4_i32_55 = arith.constant 4 : i32
    %74 = arith.muli %c1_i32_28, %c4_i32_55 : i32
    %c2_i32_56 = arith.constant 2 : i32
    %75 = arith.addi %74, %c2_i32_56 : i32
    %c1_i32_57 = arith.constant 1 : i32
    %76 = arith.addi %75, %c1_i32_57 : i32
    %c0_58 = arith.constant 0 : index
    %77 = arith.index_cast %76 : i32 to index
    %c0_59 = arith.constant 0 : index
    %c0_60 = arith.constant 0 : index
    %78 = vector.load %arg5[%c0_58, %77, %c0_59, %c0_60] : memref<1x8x8x8xf32, #tpu.memory_space<vmem>>, vector<1x1x8x8xf32>
    %79 = vector.shape_cast %78 : vector<1x1x8x8xf32> to vector<8x8xf32>
    %80 = vector.shape_cast %73 : vector<8x8xf32> to vector<1x1x8x8xf32>
    tpu.vector_store %arg5[%c0_58, %77, %c0_59, %c0_60], %80 {strides = array<i32>} : memref<1x8x8x8xf32, #tpu.memory_space<vmem>>, vector<1x1x8x8xf32>,
    %c2_i32_61 = arith.constant 2 : i32
    return
  }
  func.func @transform_0(%arg0: i32, %arg1: i32, %arg2: i32) -> (i32, i32, i32, i32) {
    %c0_i32 = arith.constant 0 : i32
    %c0_i32_0 = arith.constant 0 : i32
    return %arg0, %arg1, %arg2, %c0_i32 : i32, i32, i32, i32
  }
  func.func @transform_1(%arg0: i32, %arg1: i32, %arg2: i32) -> (i32, i32) {
    %c0_i32 = arith.constant 0 : i32
    %c0_i32_0 = arith.constant 0 : i32
    %c0_i32_1 = arith.constant 0 : i32
    return %c0_i32, %c0_i32_0 : i32, i32
  }
  func.func @transform_2(%arg0: i32, %arg1: i32, %arg2: i32) -> (i32, i32, i32, i32) {
    %c0_i32 = arith.constant 0 : i32
    %c0_i32_0 = arith.constant 0 : i32
    return %arg0, %arg1, %arg2, %c0_i32 : i32, i32, i32, i32
  }
}

</mosaic_0001>

<bundles_post_ra>
// kernel: tpu_custom_call.1
= control target key start
LH: loop header
LB: loop body
LE: loop exit
PB: predicated region body
PF: predicated region fallthrough
CT: control target
= control target key end

     0   :  { %s1216_s0 = inlined_call_operand.hbm [shape: f32[2,4,8,32], index: 0, kind: input, shape index: {}]   ;;  %s1217_s1 = inlined_call_operand.hbm [shape: f32[16,16], index: 1, kind: input, shape index: {}]   ;;  %s1218_s2 = inlined_call_operand.vmem [shape: f32[2,16,8,8], index: 2, kind: output, shape index: {}]  }
   0x1   :  { %1225 = sst [smem:[#allocation8_spill]] %s1217_s1 }
   0x2   :  { %7 = vsyncpa [#allocation3], 0 }
   0x3   :  { %9 = vsyncpa [#allocation3 + $0x1], 0 }
   0x4   :  { %10 = vsyncpa [#allocation5], 0  ;;  %s1008_s9 = smov 0   ;;  %s1010_s10 = smov 0  }
   0x5   :  { %s1012_s11 = smov 0   ;;  %s1014_s12 = smov 0  }
   0x6   :  { %s1016_s13 = smov 0   ;;  %s1018_s14 = smov 0  }
   0x7   :  { %s1020_s15 = smov 0   ;;  %s1022_s16 = smov 0  }
   0x8 LB: > { %s683_s17 = sadd.s32 4294967295, %s982_s16   ;;  %p59_p0 = scmp.ne.s32.totalorder %s958_s10, %s954_s9  ;;  %s982_s16 = sphi %s1022_s16, %s16_s16   ;;  %s978_s15 = sphi %s1020_s15, %s1245_s15   ;;  %s974_s14 = sphi %s1018_s14, %s1244_s14   ;;  %s970_s13 = sphi %s1016_s13, %s1243_s13   ;;  %s966_s12 = sphi %s1014_s12, %s1242_s12   ;;  %s962_s11 = sphi %s1012_s11, %s1241_s11   ;;  %s958_s10 = sphi %s1010_s10, %s1240_s10   ;;  %s954_s9 = sphi %s1008_s9, %s1239_s9  }
   0x9   : > { %p1048_p1 = scmp.eq.s32.totalorder %s683_s17, 0  ;;  %p685_p2 = scmp.ge.s32.totalorder %s982_s16, 1 }
   0xa   : > { %p121_p3 = scmp.lt.s32.totalorder %s982_s16, 5  ;;  %s984_s21 = smov [#allocation4]  }
   0xb   : > { %s1226_s18 = scalar_select %p1048_p1, 1, 0 }
   0xc   : > { %p1056_p4 = por %p1048_p1, %p59_p0  ;;  %p1060_p5 = pnand %p685_p2, %p121_p3 }
   0xd   : > { %s133_s22 = sshll.u32 %s984_s21, 4  ;;  %s1230_s1 = sld [smem:[#allocation8_spill]]  ;;  %s134_s22 = int_to_ptr.vmem [resolvable:$true] %s133_s22 }
   0xe   : > { %s1227_s19 = scalar_select %p1056_p4, 1, 0 }
   0xf   : > { %s1228_s20 = scalar_select %p1060_p5, 1, 0 }
  0x10   : > { %p771_p6 = pneg %p1060_p5 }
  0x12   : > { %p1068_p7 = pnand %p771_p6, %p1048_p1 }
  0x13   : > { %s854_s26 = scalar_lea.hbm %s1230_s1, 256 }
  0x14   : > { %p855_p8 = scmp.ne.s32.totalorder %s1230_s1, %s854_s26  ;;  %p856_p9 = pneg %p1068_p7 }
  0x15   : > { %p861_p12 = scmp.lt.u32.totalorder %s854_s26, %s1230_s1 }
  0x16   : > { %p857_p10 = pnand %p856_p9, %p855_p8 }
  0x18   : > { %p858_p11 = pneg %p857_p10 }
  0x1a   : > { %p863_p13 = pnand %p861_p12, %p858_p11 }
  0x1c   : > { %866 = shalt.err (!%p863_p13)
}
  0x1d   : > { %s867_s3 = scalar_lea.vmem %s134_s22, 256  ;;  %p875_p6 = scmp.lt.s32.totalorder %s134_s22, %s134_s22 }
  0x1e   : > { %p868_p0 = scmp.ne.s32.totalorder %s134_s22, %s867_s3  ;;  %p876_p1 = scmp.lt.s32.totalorder %s867_s3, %s867_s3 }
  0x20   : > { %p870_p2 = pnand %p868_p0, %p856_p9  ;;  %p877_p4 = por %p876_p1, %p875_p6 }
  0x22   : > { %p871_p3 = pneg %p870_p2 }
  0x24   : > { %p878_p5 = pnand %p877_p4, %p871_p3 }
  0x26   : > { %881 = shalt.err (!%p878_p5)
}
  0x27   : > { %s1223_s4 = smov 128   ;;  %s1224_s5 = smov 8  }
  0x28   : > { %774 = dma.hbm_to_vmem [thread:$0]  (!%p1068_p7), %s1230_s1, 256, %s134_s22, [#allocation5], %s1223_s4, %s1223_s4, %s1224_s5  }
  0x29   : > { %s31_s8 = sadd.s32 1, %s974_s14  ;;  %s35_s9 = sadd.s32 1, %s978_s15 }
  0x2a   : > { %p33_p1 = scmp.ge.s32.totalorder %s31_s8, 2  ;;  %s46_s17 = sadd.s32 1, %s962_s11 }
  0x2b   : > { %p53_p4 = scmp.ne.s32.totalorder %s962_s11, %s958_s10  ;;  %p54_p5 = scmp.eq.s32.totalorder %s982_s16, 0 }
  0x2c   : > { %s1247_s8 = smov (%p33_p1, %s31_s8), 0  ;;  %s1249_s9 = smov (!%p33_p1, %s35_s9), %s978_s15 }
  0x2d   : > { %s40_s21 = ssub.s32 %s974_s14, %s1247_s8  ;;  %p37_p8 = scmp.ge.s32.totalorder %s1249_s9, 2 }
  0x2e   : > { %p780_p9 = scmp.lt.s32.totalorder %s982_s16, 4  ;;  %p1103_p10 = por %p54_p5, %p53_p4 }
  0x2f   : > { %s147_s22 = sand.u32 1, %s962_s11   ;;  %s1251_s9 = smov (%p37_p8, %s1249_s9), 0 }
  0x30   : > { %s688_s24 = sshll.u32 %s147_s22, 4  ;;  %s39_s25 = ssub.s32 %s978_s15, %s1251_s9 }
  0x31   : > { %s41_s26 = sor.u32 %s40_s21, %s39_s25  ;;  %s689_s27 = sshll.u32 %s974_s14, 1 }
  0x32   : > { %p44_p7 = scmp.eq.s32.totalorder %s41_s26, 0  ;;  %s690_s28 = sshll.u32 %s978_s15, 2 }
  0x33   : > { %s158_s29 = sadd.s32 %s690_s28, %s689_s27  ;;  %s151_s30 = scalar_lea.vmem [#allocation2], %s688_s24 }
  0x34   : > { %s161_s3 = sshll.u32 %s151_s30, 4  ;;  %s691_s7 = sshll.u32 %s158_s29, 7  ;;  %s1117_s3 = int_to_ptr.vmem [resolvable:$true] %s161_s3 }
  0x35   : > { %s1115_s6 = scalar_select %p44_p7, %s962_s11, %s46_s17  }
  0x36   : > { %s1122_s1 = scalar_lea.hbm %s1216_s0, %s691_s7  ;;  %p1128_p11 = pnand %p780_p9, %p1103_p10 }
  0x37   : > { %s1132_s17 = scalar_lea.sflag [#allocation3], %s147_s22  ;;  %s882_s24 = scalar_lea.hbm %s1122_s1, 256 }
  0x38   : > { %p883_p12 = scmp.ne.s32.totalorder %s1122_s1, %s882_s24  ;;  %p884_p13 = pneg %p1128_p11 }
  0x39   : > { %s887_s23 = scalar_lea.hbm %s1216_s0, 1024  ;;  %p888_p3 = scmp.lt.u32.totalorder %s1122_s1, %s1216_s0 }
  0x3a   : > { %p885_p0 = pnand %p884_p13, %p883_p12  ;;  %p889_p6 = scmp.lt.u32.totalorder %s887_s23, %s882_s24 }
  0x3b   : > { %p891_p4 = scmp.lt.u32.totalorder %s882_s24, %s1122_s1 }
  0x3c   : > { %p886_p2 = pneg %p885_p0  ;;  %p890_p1 = por %p889_p6, %p888_p3 }
  0x3e   : > { %p892_p5 = por %p891_p4, %p890_p1 }
  0x40   : > { %p893_p8 = pnand %p892_p5, %p886_p2 }
  0x42   : > { %896 = shalt.err (!%p893_p8)
}
  0x43   : > { %s897_s22 = scalar_lea.vmem %s1117_s3, 256  ;;  %s987_s27 = smov [#allocation2]  }
  0x44   : > { %p898_p9 = scmp.ne.s32.totalorder %s1117_s3, %s897_s22  ;;  %s902_s28 = sshll.u32 %s987_s27, 4  ;;  %s903_s28 = int_to_ptr.vmem [resolvable:$false] %s902_s28 }
  0x45   : > { %s904_s29 = scalar_lea.vmem %s903_s28, 512  ;;  %p905_p12 = scmp.lt.s32.totalorder %s1117_s3, %s903_s28 }
  0x46   : > { %p900_p10 = pnand %p898_p9, %p884_p13  ;;  %p906_p0 = scmp.lt.s32.totalorder %s904_s29, %s897_s22 }
  0x48   : > { %p901_p7 = pneg %p900_p10  ;;  %p907_p3 = por %p906_p0, %p905_p12 }
  0x4a   : > { %p908_p6 = pnand %p907_p3, %p901_p7 }
  0x4c   : > { %911 = shalt.err (!%p908_p6)
}
  0x4d   : > { %s1233_s30 = smov 8   ;;  %s1234_s7 = smov 128  }
  0x4e   : > { %778 = dma.hbm_to_vmem [thread:$0]  (!%p1128_p11), %s1122_s1, 256, %s1117_s3, %s1132_s17, %s1234_s7, %s1234_s7, %s1233_s30  }
  0x4f   : > { %p1235_p13 = scmp.ne.s32.totalorder %s1228_s20, 0 }
  0x50   : > { %s175_s24 = sand.u32 (!%p1235_p13), 1, %s958_s10   ;;  %p1236_p2 = scmp.ne.s32.totalorder (!%p1235_p13), %s1227_s19, 0 }
  0x51   : > { %173 = sbr.rel (%p1235_p13) target bundleno = 542 (0x21e), region = 28  ;;  %s693_s4 = sshll.u32 (!%p1235_p13), %s175_s24, 4 }
  0x52   : > { %s176_s5 = scalar_lea.sflag (!%p1235_p13), [#allocation3], %s175_s24  ;;  %s179_s23 = scalar_lea.vmem (!%p1235_p13), [#allocation2], %s693_s4 }
  0x58   : > { %945 = dma.done.wait (%p1236_p2), %s176_s5, 256  }
  0x59   : > { %947 = vsyncadd (%p1236_p2), %s176_s5, 4294967040  ;;  %p1237_p1 = scmp.ne.s32.totalorder %s1226_s18, 0 }
  0x5b   : > { %949 = dma.done.wait (%p1237_p1), [#allocation5], 256  }
  0x5c   : > { %951 = vsyncadd (%p1237_p1), [#allocation5], 4294967040  ;;  %v988_v0 = vmov 0.0|0.0   ;;  %vm989_vm0 = vmmov 0   ;;  %v990_v1 = vmov 0.0   ;;  %v310_v2 = vld [vmem:[%s179_s23] sm:$0xff] }
  0x5d   : > { %753 = vmatprep.subr.bf16.mxu0 %v988_v0  ;;  %729 = vmatprep.mubr.msk.f32.mxu0 %vm989_vm0, %v990_v1  ;;  %v225_v3 = vld [vmem:[#allocation4] sm:$0xff]  ;;  %s991_s1 = smov 112   ;;  %v226_v4 = vld [vmem:[#allocation4 + $0x8] sm:$0xff]  ;;  %vm228_vm1 = vcmask 130048   ;;  %s695_s18 = sshll.u32 %s966_s12, 3  ;;  %vm302_vm2 = vcmask 64512  }
  0x5e   : > { %756 = vmatprep.subr.bf16.mxu1 %v988_v0  ;;  %736 = vmatprep.mubr.msk.f32.mxu1 %vm989_vm0, %v990_v1  ;;  %v707_v5 = vld [vmem:[%s179_s23 + $0x8] sm:$0xff]  ;;  %v754_v6 = vpack.c.bf16 %v226_v4, %v225_v3  ;;  %p213_p11 = scmp.lt.s32.totalorder %s970_s13, 1  ;;  %p215_p4 = scmp.lt.s32.totalorder %s695_s18, 15 }
  0x5f   : > { %312 = vrot.lane.b32.xlu0 %v310_v2, %s991_s1  ;;  %s992_s26 = smov 120  }
  0x60   : > { %755 = vmatpush3.bf16.msra.mxu0 %v754_v6  ;;  %758 = vmatpush3.bf16.msra.mxu1 %v754_v6  ;;  %s1253_s13 = smov (!%p213_p11, %s970_s13), 1  ;;  %s1255_s18 = smov (!%p215_p4, %s695_s18), 15 }
  0x61   : > { %759 = vmatprep.subr.bf16.mxu0 %v988_v0  ;;  %762 = vmatprep.subr.bf16.mxu1 %v988_v0  ;;  %s696_s19 = sshll.u32 %s1253_s13, 4 }
  0x62   : > { %s221_s20 = sadd.s32 %s696_s19, %s1255_s18 }
  0x63   : > { %479 = vrot.lane.b32.xlu0 %v707_v5, %s991_s1  ;;  %730 = vmatmul.mubr.msk.f32.vlgmr.msra.gmra.mrb[0].mxu0 %vm228_vm1, %v310_v2  ;;  %s697_s3 = sshll.u32 %s221_s20, 3 }
  0x64   : > { %761 = vmatpush3.bf16.msra.mxu0 %v754_v6  ;;  %743 = vmatprep.mubr.msk.f32.mxu0 %vm989_vm0, %v990_v1  ;;  %s223_s25 = scalar_lea.vmem %s1218_s2, %s697_s3 }
  0x67   : > { %744 = vmatmul.mubr.msk.f32.vlgmr.msra.gmra.mrb[2].mxu0 %vm228_vm1, %v707_v5 }
  0xd1   : > { %v313_v7 = vpop.permute.xlu0 %312 }
  0xd2   : > { %737 = vmatmul.mubr.msk.f32.vlgmr.msra.gmra.mrb[0].mxu1 %vm228_vm1, %v313_v7 }
  0xd3   : > { %764 = vmatpush3.bf16.msra.mxu1 %v754_v6  ;;  %750 = vmatprep.mubr.msk.f32.mxu1 %vm989_vm0, %v990_v1 }
  0xd5   : > { %v480_v8 = vpop.permute.xlu0 %479 }
  0xd6   : > { %751 = vmatmul.mubr.msk.f32.vlgmr.msra.gmra.mrb[2].mxu1 %vm228_vm1, %v480_v8 }
 0x136   : > { %v298_v9 = vpop.f32.mrb[0].mxu0 }
 0x137   : > { %303 = vst.msk [vmem:[%s223_s25] sm:$0xff] %vm302_vm2, %v298_v9  ;;  %v731_v10 = vpop.f32.mrb[1].mxu0  ;;  %305 = vrot.lane.b32.xlu1 %v298_v9, %s992_s26 }
 0x13a   : > { %v465_v11 = vpop.f32.mrb[2].mxu0 }
 0x13b   : > { %705 = vst.msk [vmem:[%s223_s25 + $0x20] sm:$0xff] %vm302_vm2, %v465_v11  ;;  %v745_v12 = vpop.f32.mrb[3].mxu0  ;;  %472 = vrot.lane.b32.xlu0 %v465_v11, %s992_s26 }
 0x1a5   : > { %v382_v13 = vpop.f32.mrb[0].mxu1 }
 0x1a6   : > { %701 = vst.msk [vmem:[%s223_s25 + $0x10] sm:$0xff] %vm302_vm2, %v382_v13  ;;  %v738_v14 = vpop.f32.mrb[1].mxu1  ;;  %389 = vrot.lane.b32.xlu1 %v382_v13, %s992_s26 }
 0x1a9   : > { %v549_v15 = vpop.f32.mrb[2].mxu1  ;;  %v306_v17 = vpop.permute.xlu1 %305 }
 0x1aa   : > { %709 = vst.msk [vmem:[%s223_s25 + $0x30] sm:$0xff] %vm302_vm2, %v549_v15  ;;  %v752_v16 = vpop.f32.mrb[3].mxu1  ;;  %556 = vrot.lane.b32.xlu1 %v549_v15, %s992_s26  ;;  %699 = vst.msk [vmem:[%s223_s25 + $0x8] sm:$0xff] %vm302_vm2, %v306_v17 }
 0x1ad   : > { %v473_v18 = vpop.permute.xlu0 %472 }
 0x1ae   : > { %706 = vst.msk [vmem:[%s223_s25 + $0x28] sm:$0xff] %vm302_vm2, %v473_v18 }
 0x218   : > { %v390_v19 = vpop.permute.xlu1 %389 }
 0x219   : > { %702 = vst.msk [vmem:[%s223_s25 + $0x18] sm:$0xff] %vm302_vm2, %v390_v19 }
 0x21c   : > { %v557_v20 = vpop.permute.xlu1 %556 }
 0x21d   : > { %710 = vst.msk [vmem:[%s223_s25 + $0x38] sm:$0xff] %vm302_vm2, %v557_v20 }
 0x21e PF: > { %s16_s16 = sadd.s32 1, %s982_s16   ;;  %s1238_s22 = smov %s1251_s9 }
 0x21f   : > { %p13_p5 = scmp.ge.s32.totalorder %s16_s16, 6   ;;  %s1239_s9 = smov %s958_s10 }
 0x220   : > { %s1240_s10 = smov %s962_s11  ;;  %s1241_s11 = smov %s1115_s6 }
 0x221   : > { %s1242_s12 = smov %s974_s14  ;;  %s1243_s13 = smov %s978_s15 }
 0x222   : > { %s1244_s14 = smov %s1247_s8  ;;  %s1245_s15 = smov %s1238_s22 }
 0x223   :  { %15 = sbr.rel (!%p13_p5) target bundleno = 8 (0x8), region = 80 }
 0x22a   :  { %597 = vsyncpa [#allocation3], 1 }
 0x22b   :  { %599 = vsyncpa [#allocation3 + $0x1], 1 }
 0x22c   :  { %600 = vsyncpa [#allocation5], 1 }

</bundles_post_ra>
